<compile_context>
chip_gen: v7x
topology: tpu7x:2x2x1
jax: 0.10.0
libtpu: 0.0.40
codegen_flags: <defaults>
</compile_context>

<pallas_src>
import jax
import jax.numpy as jnp
from jax.experimental import pallas as pl
from jax.experimental.pallas import tpu as pltpu

ACTION_BOUND = 1.0
STATE_DIM = 4
HIDDEN_DIM = 128
ACTION_DIM = 2

K1_PAD = 8    # x^T rows: 4 state dims + 1 ones-row (bias) + 3 zero pad
OUT_PAD = 8   # fc3 output rows padded to one sublane group


def policy_net_kernel(x_ref, w1_ref, w2_ref, b2_ref, w3_ref, b3_ref, o_ref):
    # ---- fc1 (transposed): h1^T (128, TM) = w1_aug (128, 8) @ x_aug^T (8, TM).
    # Bias is folded into w1_aug via the constant-1 row of x_aug^T.  f32 MXU.
    h1 = jnp.dot(w1_ref[...], x_ref[...], preferred_element_type=jnp.float32)
    h1 = jnp.maximum(h1, 0.0).astype(jnp.bfloat16)            # (128, TM) bf16

    # ---- fc2: bf16 MXU operands, f32 accumulate.  Bias/ReLU epilogue runs in
    # b2's dtype (bf16 on v6e/v7x, f32 on v5e -- chosen by the wrapper).
    h2 = jnp.dot(w2_ref[...], h1, preferred_element_type=jnp.float32)
    h2 = jnp.maximum(h2.astype(b2_ref.dtype) + b2_ref[...], 0.0)
    h2 = h2.astype(jnp.bfloat16)                               # (128, TM) bf16

    # ---- fc3: (8, TM) lane-dense output block; bias + tanh * bound in f32.
    out = jnp.dot(w3_ref[...], h2, preferred_element_type=jnp.float32)
    out = out + b3_ref[...]                                    # (8, TM) f32
    o_ref[...] = (jnp.tanh(out) * ACTION_BOUND).astype(o_ref.dtype)


def _bf16_epilogue_ok():
    """bf16 VALU path exists on v6e/v7x; keep f32 elementwise elsewhere."""
    try:
        kind = jax.devices()[0].device_kind.lower()
        return ("v6" in kind) or ("v7" in kind)
    except Exception:
        return False


def _round_up(n, m):
    return ((n + m - 1) // m) * m


def policy_net_forward(x, params, *, tm=1024):
    """x: (B, STATE_DIM) float32 -> (B, ACTION_DIM) float32."""
    w1, b1, w2, b2, w3, b3 = params
    B = x.shape[0]
    ep_dtype = jnp.bfloat16 if _bf16_epilogue_ok() else jnp.float32

    # ---- weight prep (transposed, done once per call; tiny) -----------------
    # fc1: augmented (128, 8) weight -- cols 0..3 = w1^T, col 4 = b1, rest 0.
    w1_aug = jnp.zeros((HIDDEN_DIM, K1_PAD), jnp.float32)
    w1_aug = w1_aug.at[:, :STATE_DIM].set(w1.T)
    w1_aug = w1_aug.at[:, STATE_DIM].set(b1.reshape(-1))
    # fc2: bf16 MXU operand; bias in epilogue dtype.
    w2_t = w2.T.astype(jnp.bfloat16)                               # (128, 128)
    b2_t = b2.reshape(HIDDEN_DIM, 1).astype(ep_dtype)              # (128, 1)
    # fc3: output rows zero-padded 2 -> 8 for a sublane-aligned slab.
    w3_t = jnp.zeros((OUT_PAD, HIDDEN_DIM), jnp.bfloat16)
    w3_t = w3_t.at[:ACTION_DIM, :].set(w3.T.astype(jnp.bfloat16))  # (8, 128)
    b3_t = jnp.zeros((OUT_PAD, 1), jnp.float32)
    b3_t = b3_t.at[:ACTION_DIM, 0].set(b3.reshape(-1))             # (8, 1)

    # ---- batch tiling: TM is the lane axis -> multiple of 128; cap so v7x's
    # two TensorCores both get grid steps once B >= 256; pad B to a full grid.
    b128 = max(128, _round_up(B, 128))
    tm_eff = min(tm, b128)
    if b128 >= 256:
        tm_eff = min(tm_eff, _round_up(b128 // 2, 128))
    b_pad = _round_up(b128, tm_eff)
    grid = (b_pad // tm_eff,)

    # x^T padded to 8 rows; row STATE_DIM = 1.0 feeds the folded fc1 bias.
    xt = jnp.zeros((K1_PAD, b_pad), jnp.float32)
    xt = xt.at[STATE_DIM, :].set(1.0)
    xt = xt.at[:STATE_DIM, :B].set(x.T)

    cost = pl.CostEstimate(
        flops=2 * b_pad * (K1_PAD * HIDDEN_DIM
                           + HIDDEN_DIM * HIDDEN_DIM
                           + HIDDEN_DIM * OUT_PAD),
        transcendentals=b_pad * OUT_PAD,
        bytes_accessed=(xt.size * 4 + w1_aug.size * 4
                        + w2_t.size * 2 + b2_t.size * b2_t.dtype.itemsize
                        + w3_t.size * 2 + b3_t.size * 4
                        + OUT_PAD * b_pad * 4),
    )

    out_t = pl.pallas_call(
        policy_net_kernel,
        out_shape=jax.ShapeDtypeStruct((OUT_PAD, b_pad), jnp.float32),
        grid=grid,
        in_specs=[
            pl.BlockSpec((K1_PAD, tm_eff), lambda i: (0, i)),          # x^T tile
            pl.BlockSpec((HIDDEN_DIM, K1_PAD), lambda i: (0, 0)),      # w1 aug
            pl.BlockSpec((HIDDEN_DIM, HIDDEN_DIM), lambda i: (0, 0)),  # w2^T bf16
            pl.BlockSpec((HIDDEN_DIM, 1), lambda i: (0, 0)),           # b2^T
            pl.BlockSpec((OUT_PAD, HIDDEN_DIM), lambda i: (0, 0)),     # w3^T pad bf16
            pl.BlockSpec((OUT_PAD, 1), lambda i: (0, 0)),              # b3^T pad
        ],
        out_specs=pl.BlockSpec((OUT_PAD, tm_eff), lambda i: (0, i)),
        compiler_params=pltpu.CompilerParams(
            dimension_semantics=("parallel",)),
        cost_estimate=cost,
    )(xt, w1_aug, w2_t, b2_t, w3_t, b3_t)

    return out_t[:ACTION_DIM, :B].T


def init_params(key):
    """Deterministic init mirroring nn.Linear's U(-1/sqrt(fan_in), 1/sqrt(fan_in))."""
    ks = jax.random.split(key, 6)

    def linear(kw, kb, fan_in, fan_out):
        bound = 1.0 / jnp.sqrt(jnp.float32(fan_in))
        w = jax.random.uniform(kw, (fan_in, fan_out), jnp.float32,
                               minval=-bound, maxval=bound)
        b = jax.random.uniform(kb, (1, fan_out), jnp.float32,
                               minval=-bound, maxval=bound)
        return w, b

    w1, b1 = linear(ks[0], ks[1], STATE_DIM, HIDDEN_DIM)
    w2, b2 = linear(ks[2], ks[3], HIDDEN_DIM, HIDDEN_DIM)
    w3, b3 = linear(ks[4], ks[5], HIDDEN_DIM, ACTION_DIM)
    return (w1, b1, w2, b2, w3, b3)


def reference_forward(x, params):
    w1, b1, w2, b2, w3, b3 = params
    h1 = jnp.maximum(x @ w1 + b1, 0.0)
    h2 = jnp.maximum(h1 @ w2 + b2, 0.0)
    return jnp.tanh(h2 @ w3 + b3) * ACTION_BOUND


if __name__ == "__main__":
    key = jax.random.PRNGKey(0)
    k_params, k_x, k_x2 = jax.random.split(key, 3)

    params = init_params(k_params)

    # Small batch (single tile; batch padded to one 128-lane block).
    batch = 4
    x = jax.random.normal(k_x, (batch, STATE_DIM), jnp.float32)
    out = jax.block_until_ready(policy_net_forward(x, params))
    ref = reference_forward(x, params)
    assert out.shape == (batch, ACTION_DIM)
    # fc2/fc3 use bf16 MXU operands (f32 accumulate) -> loose-ish tolerance.
    assert jnp.allclose(out, ref, atol=3e-2, rtol=3e-2)

    # Larger, non-multiple batch: exercises a 2-step pipelined grid + padding.
    batch2 = 300
    x2 = jax.random.normal(k_x2, (batch2, STATE_DIM), jnp.float32)
    out2 = jax.block_until_ready(policy_net_forward(x2, params))
    ref2 = reference_forward(x2, params)
    assert out2.shape == (batch2, ACTION_DIM)
    assert jnp.allclose(out2, ref2, atol=3e-2, rtol=3e-2)

    print("KERNEL_OK")
</pallas_src>

<mosaic_0001>
module attributes {stable_mosaic.version = 11 : i64} {
  func.func @policy_net_kernel(%arg0: i32, %arg1: memref<8x128xf32, #tpu.memory_space<vmem>>, %arg2: memref<128x8xf32, #tpu.memory_space<vmem>>, %arg3: memref<128x128xbf16, #tpu.memory_space<vmem>>, %arg4: memref<128x1xf32, #tpu.memory_space<vmem>>, %arg5: memref<8x128xbf16, #tpu.memory_space<vmem>>, %arg6: memref<8x1xf32, #tpu.memory_space<vmem>>, %arg7: memref<8x128xf32, #tpu.memory_space<vmem>>) attributes {dimension_semantics = [#tpu.dimension_semantics<parallel>], iteration_bounds = array<i64: 1>, scalar_prefetch = 0 : i64, scratch_operands = 0 : i64, tpu.core_type = #tpu.core_type<tc>, window_params = [{transform_indices = @transform_0, window_bounds = array<i64: 8, 128>}, {pipeline_mode = #tpu.pipeline_mode<synchronous>, transform_indices = @transform_1, window_bounds = array<i64: 128, 8>}, {pipeline_mode = #tpu.pipeline_mode<synchronous>, transform_indices = @transform_2, window_bounds = array<i64: 128, 128>}, {pipeline_mode = #tpu.pipeline_mode<synchronous>, transform_indices = @transform_3, window_bounds = array<i64: 128, 1>}, {pipeline_mode = #tpu.pipeline_mode<synchronous>, transform_indices = @transform_4, window_bounds = array<i64: 8, 128>}, {pipeline_mode = #tpu.pipeline_mode<synchronous>, transform_indices = @transform_5, window_bounds = array<i64: 8, 1>}, {transform_indices = @transform_6, window_bounds = array<i64: 8, 128>}]} {
    %c0 = arith.constant 0 : index
    %c0_0 = arith.constant 0 : index
    %0 = vector.load %arg2[%c0, %c0_0] : memref<128x8xf32, #tpu.memory_space<vmem>>, vector<128x8xf32>
    %c0_1 = arith.constant 0 : index
    %c0_2 = arith.constant 0 : index
    %1 = vector.load %arg1[%c0_1, %c0_2] : memref<8x128xf32, #tpu.memory_space<vmem>>, vector<8x128xf32>
    %cst = arith.constant dense<0.000000e+00> : vector<128x128xf32>
    %2 = tpu.matmul %0, %1, %cst {dimension_numbers = #tpu.dot_dimension_numbers<[1], [0], [0], [1], [0, 0, 1, 1], [], []>} : vector<128x8xf32>, vector<8x128xf32>, vector<128x128xf32> -> vector<128x128xf32>
    %cst_3 = arith.constant 0.000000e+00 : f32
    %3 = vector.broadcast %cst_3 : f32 to vector<128x128xf32>
    %4 = arith.maximumf %2, %3 : vector<128x128xf32>
    %5 = arith.truncf %4 : vector<128x128xf32> to vector<128x128xbf16>
    %c0_4 = arith.constant 0 : index
    %c0_5 = arith.constant 0 : index
    %6 = vector.load %arg3[%c0_4, %c0_5] : memref<128x128xbf16, #tpu.memory_space<vmem>>, vector<128x128xbf16>
    %cst_6 = arith.constant dense<0.000000e+00> : vector<128x128xf32>
    %7 = tpu.matmul %6, %5, %cst_6 {dimension_numbers = #tpu.dot_dimension_numbers<[1], [0], [0], [1], [0, 0, 1, 1], [], []>} : vector<128x128xbf16>, vector<128x128xbf16>, vector<128x128xf32> -> vector<128x128xf32>
    %c0_7 = arith.constant 0 : index
    %c0_8 = arith.constant 0 : index
    %8 = vector.load %arg4[%c0_7, %c0_8] : memref<128x1xf32, #tpu.memory_space<vmem>>, vector<128x1xf32>
    %9 = vector.broadcast %8 : vector<128x1xf32> to vector<128x128xf32>
    %10 = arith.addf %7, %9 : vector<128x128xf32>
    %cst_9 = arith.constant 0.000000e+00 : f32
    %11 = vector.broadcast %cst_9 : f32 to vector<128x128xf32>
    %12 = arith.maximumf %10, %11 : vector<128x128xf32>
    %13 = arith.truncf %12 : vector<128x128xf32> to vector<128x128xbf16>
    %c0_10 = arith.constant 0 : index
    %c0_11 = arith.constant 0 : index
    %14 = vector.load %arg5[%c0_10, %c0_11] : memref<8x128xbf16, #tpu.memory_space<vmem>>, vector<8x128xbf16>
    %cst_12 = arith.constant dense<0.000000e+00> : vector<8x128xf32>
    %15 = tpu.matmul %14, %13, %cst_12 {dimension_numbers = #tpu.dot_dimension_numbers<[1], [0], [0], [1], [0, 0, 1, 1], [], []>} : vector<8x128xbf16>, vector<128x128xbf16>, vector<8x128xf32> -> vector<8x128xf32>
    %c0_13 = arith.constant 0 : index
    %c0_14 = arith.constant 0 : index
    %16 = vector.load %arg6[%c0_13, %c0_14] : memref<8x1xf32, #tpu.memory_space<vmem>>, vector<8x1xf32>
    %17 = vector.broadcast %16 : vector<8x1xf32> to vector<8x128xf32>
    %18 = arith.addf %15, %17 : vector<8x128xf32>
    %19 = math.tanh %18 : vector<8x128xf32>
    %cst_15 = arith.constant 1.000000e+00 : f32
    %20 = vector.broadcast %cst_15 : f32 to vector<8x128xf32>
    %21 = arith.mulf %19, %20 : vector<8x128xf32>
    %c0_16 = arith.constant 0 : index
    %c0_17 = arith.constant 0 : index
    %22 = vector.load %arg7[%c0_16, %c0_17] : memref<8x128xf32, #tpu.memory_space<vmem>>, vector<8x128xf32>
    tpu.vector_store %arg7[%c0_16, %c0_17], %21 {strides = array<i32>} : memref<8x128xf32, #tpu.memory_space<vmem>>, vector<8x128xf32>,
    return
  }
  func.func @transform_0(%arg0: i32) -> (i32, i32) {
    %c0_i32 = arith.constant 0 : i32
    %c0_i32_0 = arith.constant 0 : i32
    return %c0_i32, %arg0 : i32, i32
  }
  func.func @transform_1(%arg0: i32) -> (i32, i32) {
    %c0_i32 = arith.constant 0 : i32
    %c0_i32_0 = arith.constant 0 : i32
    %c0_i32_1 = arith.constant 0 : i32
    return %c0_i32, %c0_i32_0 : i32, i32
  }
  func.func @transform_2(%arg0: i32) -> (i32, i32) {
    %c0_i32 = arith.constant 0 : i32
    %c0_i32_0 = arith.constant 0 : i32
    %c0_i32_1 = arith.constant 0 : i32
    return %c0_i32, %c0_i32_0 : i32, i32
  }
  func.func @transform_3(%arg0: i32) -> (i32, i32) {
    %c0_i32 = arith.constant 0 : i32
    %c0_i32_0 = arith.constant 0 : i32
    %c0_i32_1 = arith.constant 0 : i32
    return %c0_i32, %c0_i32_0 : i32, i32
  }
  func.func @transform_4(%arg0: i32) -> (i32, i32) {
    %c0_i32 = arith.constant 0 : i32
    %c0_i32_0 = arith.constant 0 : i32
    %c0_i32_1 = arith.constant 0 : i32
    return %c0_i32, %c0_i32_0 : i32, i32
  }
  func.func @transform_5(%arg0: i32) -> (i32, i32) {
    %c0_i32 = arith.constant 0 : i32
    %c0_i32_0 = arith.constant 0 : i32
    %c0_i32_1 = arith.constant 0 : i32
    return %c0_i32, %c0_i32_0 : i32, i32
  }
  func.func @transform_6(%arg0: i32) -> (i32, i32) {
    %c0_i32 = arith.constant 0 : i32
    %c0_i32_0 = arith.constant 0 : i32
    return %c0_i32, %arg0 : i32, i32
  }
}

</mosaic_0001>

<bundles_post_ra>
// kernel: tpu_custom_call.1
= control target key start
LH: loop header
LB: loop body
LE: loop exit
PB: predicated region body
PF: predicated region fallthrough
CT: control target
= control target key end

     0   :  { %vm42_vm0 = vcmask 64512   ;;  %s993_s0 = inlined_call_operand.vmem [shape: f32[8,128], index: 0, kind: input, shape index: {}]   ;;  %s994_s1 = inlined_call_operand.vmem [shape: f32[128,8], index: 1, kind: input, shape index: {}]   ;;  %s995_s2 = inlined_call_operand.vmem [shape: bf16[128,128], index: 2, kind: input, shape index: {}]   ;;  %s996_s3 = inlined_call_operand.vmem [shape: f32[128,1], index: 3, kind: input, shape index: {}]   ;;  %s997_s4 = inlined_call_operand.vmem [shape: bf16[8,128], index: 4, kind: input, shape index: {}]   ;;  %s998_s5 = inlined_call_operand.vmem [shape: f32[8,1], index: 5, kind: input, shape index: {}]   ;;  %s999_s6 = inlined_call_operand.hbm [shape: f32[8,128], index: 6, kind: output, shape index: {}]  }
   0x1   :  { %v41_v0 = vld [vmem:[%s993_s0] sm:$0xff]  ;;  %v26_v2 = vld [vmem:[%s994_s1 + $0x8] sm:$0xff]  ;;  %v27_v3 = vld [vmem:[%s994_s1 + $0x10] sm:$0xff] }
   0x2   :  { %v25_v1 = vld [vmem:[%s994_s1] sm:$0xff]  ;;  %670 = vmatprep.subr.mxu0 %v41_v0  ;;  %v28_v4 = vld [vmem:[%s994_s1 + $0x18] sm:$0xff]  ;;  %v30_v6 = vld [vmem:[%s994_s1 + $0x28] sm:$0xff] }
   0x3   :  { %672 = vmatprep.mubr.msk.f32.mxu0 %vm42_vm0, %v25_v1  ;;  %671 = vmatpush3.msra.mxu0 %v41_v0  ;;  %v29_v5 = vld [vmem:[%s994_s1 + $0x20] sm:$0xff]  ;;  %v31_v7 = vld [vmem:[%s994_s1 + $0x30] sm:$0xff] }
   0x4   :  { %673 = vmatmul.mubr.msk.f32.vlgmr.msra.gmra.mrb[0].mxu0 %vm42_vm0, %v26_v2 }
   0x5   :  { %675 = vmatprep.mubr.msk.f32.mxu0 %vm42_vm0, %v27_v3 }
   0x8   :  { %676 = vmatmul.mubr.msk.f32.gmra.mrb[2].mxu0 %vm42_vm0, %v28_v4 }
   0x9   :  { %678 = vmatprep.mubr.msk.f32.mxu0 %vm42_vm0, %v29_v5 }
   0xc   :  { %679 = vmatmul.mubr.msk.f32.gmra.mrb[4].mxu0 %vm42_vm0, %v30_v6 }
   0xd   :  { %11 = vsyncpa [#allocation3], 0  ;;  %681 = vmatprep.mubr.msk.f32.mxu0 %vm42_vm0, %v31_v7  ;;  %v32_v8 = vld [vmem:[%s994_s1 + $0x38] sm:$0xff]  ;;  %v33_v9 = vld [vmem:[%s994_s1 + $0x40] sm:$0xff]  ;;  %v788_v20 = vmov 0   ;;  %vm790_vm1 = vmmov 0  }
   0xe   :  { %v34_v10 = vld [vmem:[%s994_s1 + $0x48] sm:$0xff]  ;;  %v35_v11 = vld [vmem:[%s994_s1 + $0x50] sm:$0xff]  ;;  %v36_v12 = vld [vmem:[%s994_s1 + $0x58] sm:$0xff]  ;;  %752 = vset.pattern.permute.xlu0 %v788_v20  ;;  %753 = vset.pattern.permute.xlu1 %v788_v20  ;;  %s791_s27 = smov [#allocation2]  }
   0xf   :  { %v37_v13 = vld [vmem:[%s994_s1 + $0x60] sm:$0xff]  ;;  %v38_v14 = vld [vmem:[%s994_s1 + $0x68] sm:$0xff]  ;;  %v39_v15 = vld [vmem:[%s994_s1 + $0x70] sm:$0xff]  ;;  %s596_s28 = sshll.u32 %s791_s27, 4  ;;  %s597_s28 = int_to_ptr.vmem [resolvable:$true] %s596_s28 }
  0x10   :  { %682 = vmatmul.mubr.msk.f32.gmra.mrb[6].mxu0 %vm42_vm0, %v32_v8  ;;  %v40_v16 = vld [vmem:[%s994_s1 + $0x78] sm:$0xff]  ;;  %v754_v17 = vld [vmem:[%s995_s2] sm:$0xff]   ;;  %v278_v19 = vld [vmem:[%s996_s3 + $0x10] sm:$0xff]  ;;  %s764_s0 = scalar_lea.vmem %s597_s28, 128  ;;  %p769_p1 = scmp.lt.s32.totalorder %s597_s28, %s597_s28 }
  0x11   :  { %684 = vmatprep.mubr.msk.f32.mxu0 %vm42_vm0, %v33_v9  ;;  %712 = vmatprep.mubr.bf16.mxu1 %v754_v17  ;;  %v276_v18 = vld [vmem:[%s996_s3] sm:$0xff]  ;;  %v277_v21 = vld [vmem:[%s996_s3 + $0x8] sm:$0xff]  ;;  %v279_v22 = vld [vmem:[%s996_s3 + $0x18] sm:$0xff]  ;;  %p765_p0 = scmp.ne.s32.totalorder %s597_s28, %s764_s0  ;;  %p770_p2 = scmp.lt.s32.totalorder %s764_s0, %s764_s0 }
  0x12   :  { %294 = vperm.xlu0 %752, %v276_v18   ;;  %304 = vperm.xlu1 %753, %v278_v19   ;;  %v280_v23 = vld [vmem:[%s996_s3 + $0x20] sm:$0xff]  ;;  %v281_v24 = vld [vmem:[%s996_s3 + $0x28] sm:$0xff]  ;;  %v282_v25 = vld [vmem:[%s996_s3 + $0x30] sm:$0xff]  ;;  %v789_v19 = vmov 0.0  }
  0x13   :  { %v283_v26 = vld [vmem:[%s996_s3 + $0x38] sm:$0xff]  ;;  %v284_v27 = vld [vmem:[%s996_s3 + $0x40] sm:$0xff]  ;;  %v285_v28 = vld [vmem:[%s996_s3 + $0x48] sm:$0xff]  ;;  %728 = vmatprep.subr.bf16.mxu0 %v789_v19  ;;  %p771_p3 = por %p770_p2, %p769_p1 }
  0x14   :  { %685 = vmatmul.mubr.msk.f32.gmra.mrb[8].mxu0 %vm42_vm0, %v34_v10  ;;  %v286_v29 = vld [vmem:[%s996_s3 + $0x50] sm:$0xff]  ;;  %v287_v30 = vld [vmem:[%s996_s3 + $0x58] sm:$0xff]  ;;  %v288_v31 = vld [vmem:[%s996_s3 + $0x60] sm:$0xff] }
  0x15   :  { %687 = vmatprep.mubr.msk.f32.mxu0 %vm42_vm0, %v35_v11  ;;  %v289_v32 = vld [vmem:[%s996_s3 + $0x68] sm:$0xff]  ;;  %v290_v33 = vld [vmem:[%s996_s3 + $0x70] sm:$0xff]  ;;  %v291_v34 = vld [vmem:[%s996_s3 + $0x78] sm:$0xff]  ;;  %p772_p4 = pnand %p771_p3, %p765_p0 }
  0x16   :  { %299 = vperm.xlu0 %752, %v277_v21   ;;  %309 = vperm.xlu1 %753, %v279_v22   ;;  %v542_v35 = vld [vmem:[%s998_s5] sm:$0xff]  ;;  %v760_v17 = vld [vmem:[%s995_s2 + $0x30] sm:$0xff]   ;;  %v761_v18 = vld [vmem:[%s995_s2 + $0x38] sm:$0xff]  }
  0x18   :  { %688 = vmatmul.mubr.msk.f32.gmra.mrb[10].mxu0 %vm42_vm0, %v36_v12  ;;  %v755_v12 = vld [vmem:[%s995_s2 + $0x8] sm:$0xff]  }
  0x19   :  { %690 = vmatprep.mubr.msk.f32.mxu0 %vm42_vm0, %v37_v13  ;;  %v756_v13 = vld [vmem:[%s995_s2 + $0x10] sm:$0xff]  }
  0x1a   :  { %314 = vperm.xlu0 %752, %v280_v23   ;;  %319 = vperm.xlu1 %753, %v281_v24  }
  0x1c   :  { %691 = vmatmul.mubr.msk.f32.gmra.mrb[12].mxu0 %vm42_vm0, %v38_v14  ;;  %v757_v14 = vld [vmem:[%s995_s2 + $0x18] sm:$0xff]  }
  0x1d   :  { %693 = vmatprep.mubr.msk.f32.mxu0 %vm42_vm0, %v39_v15  ;;  %v758_v15 = vld [vmem:[%s995_s2 + $0x20] sm:$0xff]  }
  0x1e   :  { %324 = vperm.xlu0 %752, %v282_v25   ;;  %329 = vperm.xlu1 %753, %v283_v26  }
  0x20   :  { %694 = vmatmul.mubr.msk.f32.gmra.mrb[14].mxu0 %vm42_vm0, %v40_v16  ;;  %v759_v16 = vld [vmem:[%s995_s2 + $0x28] sm:$0xff]  }
  0x21   :  { %744 = vmatprep.mubr.msk.bf16.mxu0 %vm790_vm1, %v789_v19 }
  0x22   :  { %334 = vperm.xlu0 %752, %v284_v27   ;;  %339 = vperm.xlu1 %753, %v285_v28  }
  0x26   :  { %344 = vperm.xlu0 %752, %v286_v29   ;;  %349 = vperm.xlu1 %753, %v287_v30  }
  0x2a   :  { %354 = vperm.xlu0 %752, %v288_v31   ;;  %359 = vperm.xlu1 %753, %v289_v32  }
  0x2e   :  { %364 = vperm.xlu0 %752, %v290_v33   ;;  %369 = vperm.xlu1 %753, %v291_v34  }
  0x32   :  { %545 = vperm.xlu0 %752, %v542_v35  }
  0x91   :  { %v295_v20 = vpop.permute.xlu0 %294  ;;  %v305_v21 = vpop.permute.xlu1 %304 }
  0x95   :  { %v300_v22 = vpop.permute.xlu0 %299  ;;  %v310_v23 = vpop.permute.xlu1 %309 }
  0x99   :  { %v315_v24 = vpop.permute.xlu0 %314  ;;  %v320_v25 = vpop.permute.xlu1 %319 }
  0x9d   :  { %v325_v26 = vpop.permute.xlu0 %324  ;;  %v330_v30 = vpop.permute.xlu1 %329 }
  0xd7   :  { %v674_v36 = vpop.f32.mrb[0].mxu0 }
  0xd8   :  { %v237_v37 = vmax.f32 %v674_v36, 0.0  ;;  %v157_v38 = vpop.f32.mrb[1].mxu0 }
  0xd9   :  { %v236_v39 = vmax.f32 %v157_v38, 0.0  ;;  %v335_v38 = vpop.permute.xlu0 %334 }
  0xdb   :  { %v677_v40 = vpop.f32.mrb[2].mxu0  ;;  %v252_v41 = vpack.c.bf16 %v237_v37, %v236_v39 }
  0xdc   :  { %v239_v42 = vmax.f32 %v677_v40, 0.0  ;;  %v167_v43 = vpop.f32.mrb[3].mxu0 }
  0xdd   :  { %v238_v44 = vmax.f32 %v167_v43, 0.0  ;;  %696 = vmatprep.subr.bf16.mxu1 %v252_v41 }
  0xde   :  { %697 = vmatpush3.bf16.msra.mxu1 %v252_v41 }
  0xdf   :  { %v253_v45 = vpack.c.bf16 %v239_v42, %v238_v44  ;;  %v680_v46 = vpop.f32.mrb[4].mxu0  ;;  %v340_v42 = vpop.permute.xlu1 %339 }
  0xe0   :  { %v241_v47 = vmax.f32 %v680_v46, 0.0  ;;  %v177_v48 = vpop.f32.mrb[5].mxu0 }
  0xe1   :  { %v240_v49 = vmax.f32 %v177_v48, 0.0  ;;  %698 = vmatprep.subr.bf16.mxu1 %v253_v45 }
  0xe2   :  { %699 = vmatpush3.bf16.msra.mxu1 %v253_v45 }
  0xe3   :  { %v254_v50 = vpack.c.bf16 %v241_v47, %v240_v49  ;;  %v683_v51 = vpop.f32.mrb[6].mxu0 }
  0xe4   :  { %v243_v52 = vmax.f32 %v683_v51, 0.0  ;;  %v187_v53 = vpop.f32.mrb[7].mxu0  ;;  %v345_v51 = vpop.permute.xlu0 %344 }
  0xe5   :  { %v242_v54 = vmax.f32 %v187_v53, 0.0  ;;  %700 = vmatprep.subr.bf16.mxu1 %v254_v50 }
  0xe6   :  { %701 = vmatpush3.bf16.msra.mxu1 %v254_v50 }
  0xe7   :  { %v255_v55 = vpack.c.bf16 %v243_v52, %v242_v54  ;;  %v686_v56 = vpop.f32.mrb[8].mxu0 }
  0xe8   :  { %v245_v57 = vmax.f32 %v686_v56, 0.0  ;;  %v197_v58 = vpop.f32.mrb[9].mxu0 }
  0xe9   :  { %v244_v59 = vmax.f32 %v197_v58, 0.0  ;;  %702 = vmatprep.subr.bf16.mxu1 %v255_v55 }
  0xea   :  { %703 = vmatpush3.bf16.msra.mxu1 %v255_v55  ;;  %v350_v55 = vpop.permute.xlu1 %349 }
  0xeb   :  { %v256_v60 = vpack.c.bf16 %v245_v57, %v244_v59  ;;  %v689_v61 = vpop.f32.mrb[10].mxu0 }
  0xec   :  { %v247_v62 = vmax.f32 %v689_v61, 0.0  ;;  %v207_v63 = vpop.f32.mrb[11].mxu0 }
  0xed   :  { %v246_v0 = vmax.f32 %v207_v63, 0.0  ;;  %704 = vmatprep.subr.bf16.mxu1 %v256_v60  ;;  %v355_v63 = vpop.permute.xlu0 %354 }
  0xee   :  { %705 = vmatpush3.bf16.msra.mxu1 %v256_v60 }
  0xef   :  { %v257_v1 = vpack.c.bf16 %v247_v62, %v246_v0  ;;  %v692_v2 = vpop.f32.mrb[12].mxu0 }
  0xf0   :  { %v249_v3 = vmax.f32 %v692_v2, 0.0  ;;  %v217_v4 = vpop.f32.mrb[13].mxu0 }
  0xf1   :  { %v248_v5 = vmax.f32 %v217_v4, 0.0  ;;  %706 = vmatprep.subr.bf16.mxu1 %v257_v1  ;;  %v360_v4 = vpop.permute.xlu1 %359 }
  0xf2   :  { %707 = vmatpush3.bf16.msra.mxu1 %v257_v1 }
  0xf3   :  { %v258_v6 = vpack.c.bf16 %v249_v3, %v248_v5  ;;  %v695_v7 = vpop.f32.mrb[14].mxu0 }
  0xf4   :  { %v251_v8 = vmax.f32 %v695_v7, 0.0  ;;  %v227_v9 = vpop.f32.mrb[15].mxu0 }
  0xf5   :  { %v250_v10 = vmax.f32 %v227_v9, 0.0  ;;  %708 = vmatprep.subr.bf16.mxu1 %v258_v6 }
  0xf6   :  { %709 = vmatpush3.bf16.msra.mxu1 %v258_v6 }
  0xf7   :  { %v259_v11 = vpack.c.bf16 %v251_v8, %v250_v10 }
  0xf9   :  { %710 = vmatprep.subr.bf16.mxu1 %v259_v11 }
  0xfa   :  { %711 = vmatpush3.bf16.msra.mxu1 %v259_v11  ;;  %v365_v11 = vpop.permute.xlu0 %364 }
  0xfd   :  { %713 = vmatmul.mubr.bf16.vlgmr.msra.gmra.mrb[0].mxu1 %v755_v12 }
  0xfe   :  { %716 = vmatprep.mubr.bf16.mxu1 %v756_v13 }
 0x105   :  { %717 = vmatmul.mubr.bf16.gmra.mrb[4].mxu1 %v757_v14 }
 0x106   :  { %720 = vmatprep.mubr.bf16.mxu1 %v758_v15 }
 0x10d   :  { %721 = vmatmul.mubr.bf16.gmra.mrb[8].mxu1 %v759_v16  ;;  %v370_v16 = vpop.permute.xlu1 %369 }
 0x10e   :  { %724 = vmatprep.mubr.bf16.mxu1 %v760_v17 }
 0x115   :  { %725 = vmatmul.mubr.bf16.gmra.mrb[12].mxu1 %v761_v18 }
 0x1d0   :  { %v714_v27 = vpop.f32.mrb[0].mxu1 }
 0x1d1   :  { %v463_v28 = vadd.f32 %v714_v27, %v305_v21  ;;  %v454_v29 = vpop.f32.mrb[1].mxu1 }
 0x1d2   :  { %v455_v31 = vadd.f32 %v454_v29, %v295_v20  ;;  %v715_v32 = vpop.f32.mrb[2].mxu1  ;;  %v541_v29 = vld [vmem:[%s997_s4] sm:$0xf] }
 0x1d3   :  { %v466_v33 = vadd.f32 %v715_v32, %v310_v23  ;;  %v457_v34 = vpop.f32.mrb[3].mxu1  ;;  %v519_v36 = vmax.f32 %v463_v28, 0.0 }
 0x1d4   :  { %v458_v35 = vadd.f32 %v457_v34, %v300_v22  ;;  %v517_v39 = vmax.f32 %v455_v31, 0.0 }
 0x1d5   :  { %v520_v37 = vmax.f32 %v466_v33, 0.0 }
 0x1d6   :  { %v518_v40 = vmax.f32 %v458_v35, 0.0 }
 0x1d7   :  { %v534_v41 = vpack.c.bf16 %v520_v37, %v519_v36 }
 0x1d8   :  { %v533_v43 = vpack.c.bf16 %v518_v40, %v517_v39  ;;  %v718_v44 = vpop.f32.mrb[4].mxu1 }
 0x1d9   :  { %v479_v45 = vadd.f32 %v718_v44, %v325_v26  ;;  %v470_v46 = vpop.f32.mrb[5].mxu1 }
 0x1da   :  { %v471_v47 = vadd.f32 %v470_v46, %v315_v24  ;;  %v719_v48 = vpop.f32.mrb[6].mxu1  ;;  %729 = vmatpush3.bf16.msra.mxu0 %v533_v43 }
 0x1db   :  { %v482_v49 = vadd.f32 %v719_v48, %v330_v30  ;;  %v473_v50 = vpop.f32.mrb[7].mxu1  ;;  %730 = vmatprep.subr.bf16.mxu0 %v789_v19  ;;  %v523_v53 = vmax.f32 %v479_v45, 0.0  ;;  %v546_v30 = vpop.permute.xlu0 %545 }
 0x1dc   :  { %v474_v52 = vadd.f32 %v473_v50, %v320_v25  ;;  %v521_v56 = vmax.f32 %v471_v47, 0.0 }
 0x1dd   :  { %v524_v54 = vmax.f32 %v482_v49, 0.0 }
 0x1de   :  { %v522_v57 = vmax.f32 %v474_v52, 0.0  ;;  %731 = vmatpush3.bf16.msra.mxu0 %v534_v41 }
 0x1df   :  { %v536_v58 = vpack.c.bf16 %v524_v54, %v523_v53  ;;  %732 = vmatprep.subr.bf16.mxu0 %v789_v19 }
 0x1e0   :  { %v535_v59 = vpack.c.bf16 %v522_v57, %v521_v56  ;;  %v722_v60 = vpop.f32.mrb[8].mxu1 }
 0x1e1   :  { %v495_v61 = vadd.f32 %v722_v60, %v345_v51  ;;  %v486_v62 = vpop.f32.mrb[9].mxu1 }
 0x1e2   :  { %v487_v0 = vadd.f32 %v486_v62, %v335_v38  ;;  %v723_v1 = vpop.f32.mrb[10].mxu1  ;;  %733 = vmatpush3.bf16.msra.mxu0 %v535_v59 }
 0x1e3   :  { %v498_v2 = vadd.f32 %v723_v1, %v350_v55  ;;  %v489_v3 = vpop.f32.mrb[11].mxu1  ;;  %734 = vmatprep.subr.bf16.mxu0 %v789_v19  ;;  %v527_v6 = vmax.f32 %v495_v61, 0.0 }
 0x1e4   :  { %v490_v5 = vadd.f32 %v489_v3, %v340_v42  ;;  %v525_v8 = vmax.f32 %v487_v0, 0.0 }
 0x1e5   :  { %v528_v7 = vmax.f32 %v498_v2, 0.0 }
 0x1e6   :  { %v526_v9 = vmax.f32 %v490_v5, 0.0  ;;  %735 = vmatpush3.bf16.msra.mxu0 %v536_v58 }
 0x1e7   :  { %v538_v10 = vpack.c.bf16 %v528_v7, %v527_v6  ;;  %736 = vmatprep.subr.bf16.mxu0 %v789_v19 }
 0x1e8   :  { %v537_v12 = vpack.c.bf16 %v526_v9, %v525_v8  ;;  %v726_v13 = vpop.f32.mrb[12].mxu1 }
 0x1e9   :  { %v511_v14 = vadd.f32 %v726_v13, %v365_v11  ;;  %v502_v15 = vpop.f32.mrb[13].mxu1 }
 0x1ea   :  { %v503_v17 = vadd.f32 %v502_v15, %v355_v63  ;;  %v727_v18 = vpop.f32.mrb[14].mxu1  ;;  %737 = vmatpush3.bf16.msra.mxu0 %v537_v12 }
 0x1eb   :  { %v514_v20 = vadd.f32 %v727_v18, %v370_v16  ;;  %v505_v21 = vpop.f32.mrb[15].mxu1  ;;  %738 = vmatprep.subr.bf16.mxu0 %v789_v19  ;;  %v531_v23 = vmax.f32 %v511_v14, 0.0 }
 0x1ec   :  { %v506_v22 = vadd.f32 %v505_v21, %v360_v4  ;;  %v529_v25 = vmax.f32 %v503_v17, 0.0 }
 0x1ed   :  { %v532_v24 = vmax.f32 %v514_v20, 0.0 }
 0x1ee   :  { %v530_v26 = vmax.f32 %v506_v22, 0.0  ;;  %739 = vmatpush3.bf16.msra.mxu0 %v538_v10 }
 0x1ef   :  { %v540_v27 = vpack.c.bf16 %v532_v24, %v531_v23  ;;  %740 = vmatprep.subr.bf16.mxu0 %v789_v19 }
 0x1f0   :  { %v539_v28 = vpack.c.bf16 %v530_v26, %v529_v25 }
 0x1f2   :  { %741 = vmatpush3.bf16.msra.mxu0 %v539_v28 }
 0x1f3   :  { %742 = vmatprep.subr.bf16.mxu0 %v789_v19 }
 0x1f6   :  { %743 = vmatpush3.bf16.msra.mxu0 %v540_v27 }
 0x1f9   :  { %745 = vmatmul.mubr.bf16.vlgmr.msra.gmra.mrb[16].mxu0 %v541_v29 }
 0x2cc   :  { %v582_v31 = vpop.f32.mrb[16].mxu0 }
 0x2cd   :  { %v583_v32 = vadd.f32 %v582_v31, %v546_v30  ;;  %v746_v33 = vpop.f32.mrb[17].mxu0 }
 0x2ce   :  { %v585_v34 = vpop.f32.mrb[18].mxu0 }
 0x2cf   :  { %762 = vtanh.f32 %v583_v32  ;;  %v747_v35 = vpop.f32.mrb[19].mxu0 }
 0x2d9   :  { %v763_v36 = vpop.eup %762 }
 0x2da   :  { %589 = vst [vmem:[#allocation2] sm:$0xff] %v763_v36 }
 0x2db   :  { %775 = shalt.err (!%p772_p4)
}
 0x2dc   :  { %s776_s30 = scalar_lea.hbm %s999_s6, 128 }
 0x2dd   :  { %p777_p5 = scmp.ne.s32.totalorder %s999_s6, %s776_s30  ;;  %p780_p6 = scmp.lt.u32.totalorder %s776_s30, %s999_s6 }
 0x2df   :  { %p782_p7 = pnand %p780_p6, %p777_p5 }
 0x2e1   :  { %785 = shalt.err (!%p782_p7)
}
 0x2e2   :  { %599 = dma.vmem_to_hbm [thread:$0]  %s597_s28, 128, %s999_s6, [#allocation3]  }
 0x2e3   :  { %786 = dma.done.wait [#allocation3], 128  }
 0x2e4   :  { %787 = vsyncadd [#allocation3], 4294967168 }
 0x2e5   :  { %603 = vsyncpa [#allocation3], 1 }

</bundles_post_ra>
